<compile_context>
chip_gen: v7x
topology: tpu7x:2x2x1
jax: 0.10.0
libtpu: 0.0.40
codegen_flags: <defaults>
</compile_context>

<pallas_src>
import jax
import jax.numpy as jnp
from jax import lax
from jax.experimental import pallas as pl
from jax.experimental.pallas import tpu as pltpu

# Contract the trailing dim of both operands (x @ W.T with PyTorch [out, in]).
_NT_DIMS = (((1,), (1,)), ((), ()))


def _ffn_kernel(x_ref, w1_ref, b1_ref, w2_ref, b2_ref, o_ref, acc_ref):
    # x_ref:  [TM, E_pad]      w1_ref: [TH, E_pad]   b1_ref: [1, TH]
    # w2_ref: [E_pad, TH]      b2_ref: [1, E_pad]
    # o_ref:  [TM, E_pad]      acc_ref: [TM, E_pad] f32 (resident across h axis)
    h_idx = pl.program_id(1)

    # Fold the second bias into the accumulator init (no per-tile VPU add).
    @pl.when(h_idx == 0)
    def _():
        acc_ref[...] = jnp.broadcast_to(
            b2_ref[...].astype(jnp.float32), acc_ref.shape)

    x = x_ref[...]
    # First linear on this hidden slice: x @ w1[h_blk, :].T  -> [TM, TH]
    h = lax.dot_general(x, w1_ref[...], _NT_DIMS,
                        preferred_element_type=jnp.float32)
    h = jnp.maximum(h + b1_ref[...].astype(jnp.float32), 0.0)
    # Dropout: eval/inference mode == identity.
    # Second linear partial: h @ w2[:, h_blk].T accumulated over hidden tiles.
    acc_ref[...] += lax.dot_general(h.astype(x.dtype), w2_ref[...], _NT_DIMS,
                                    preferred_element_type=jnp.float32)

    @pl.when(h_idx == pl.num_programs(1) - 1)
    def _():
        o_ref[...] = acc_ref[...].astype(o_ref.dtype)


def _round_up(x, m):
    return (x + m - 1) // m * m


def _pad2d(a, rows, cols):
    pr, pc = rows - a.shape[0], cols - a.shape[1]
    if pr or pc:
        a = jnp.pad(a, ((0, pr), (0, pc)))
    return a


def feed_forward(x, w1, b1, w2, b2):
    """x: [B, S, E]; w1/w2: PyTorch-style [out, in] = [E, E]; b1/b2: [E]."""
    B, S, E = x.shape
    M = B * S
    dtype = x.dtype
    itemsize = x.dtype.itemsize

    LANE = 128
    # Hidden-dim tile: multiple of 128 lanes, capped at 512; E padded to it.
    tile_h = min(512, _round_up(E, LANE))
    E_pad = _round_up(E, tile_h)
    # Row tile: multiple of 8 sublanes, target 256 to fill the MXU.
    tile_m = min(256, _round_up(M, 8))
    M_pad = _round_up(M, tile_m)

    # Zero padding is exact: padded input cols / weight rows / biases are zero,
    # so padded hidden & output columns stay zero; padded rows are sliced off.
    x2d = _pad2d(x.reshape(M, E), M_pad, E_pad)
    w1p = _pad2d(w1, E_pad, E_pad)          # keep [out, in] layout (no .T)
    w2p = _pad2d(w2, E_pad, E_pad)
    b1p = _pad2d(b1.reshape(1, E), 1, E_pad)
    b2p = _pad2d(b2.reshape(1, E), 1, E_pad)

    grid = (M_pad // tile_m, E_pad // tile_h)

    # Working-set estimate: double-buffered in/out tiles + f32 accumulator.
    vmem_bytes = (2 * (tile_m * E_pad            # x tile
                       + tile_h * E_pad          # w1 tile
                       + tile_h                  # b1 tile
                       + E_pad * tile_h          # w2 tile
                       + E_pad                   # b2
                       + tile_m * E_pad          # out tile
                       ) * itemsize
                  + tile_m * E_pad * 4)          # acc scratch
    vmem_limit = int(min(64 * 1024 * 1024,
                         max(32 * 1024 * 1024, 2 * vmem_bytes)))

    flops = 2 * 2 * M_pad * E_pad * E_pad
    bytes_accessed = itemsize * (2 * M_pad * E_pad + 2 * E_pad * E_pad + 2 * E_pad)

    out = pl.pallas_call(
        _ffn_kernel,
        out_shape=jax.ShapeDtypeStruct((M_pad, E_pad), dtype),
        grid_spec=pltpu.PrefetchScalarGridSpec(
            num_scalar_prefetch=0,
            grid=grid,
            in_specs=[
                pl.BlockSpec((tile_m, E_pad), lambda i, h: (i, 0)),   # x rows
                pl.BlockSpec((tile_h, E_pad), lambda i, h: (h, 0)),   # w1 rows (hidden slice)
                pl.BlockSpec((1, tile_h),     lambda i, h: (0, h)),   # b1 slice
                pl.BlockSpec((E_pad, tile_h), lambda i, h: (0, h)),   # w2 cols (hidden slice)
                pl.BlockSpec((1, E_pad),      lambda i, h: (0, 0)),   # b2 (resident)
            ],
            out_specs=pl.BlockSpec((tile_m, E_pad), lambda i, h: (i, 0)),
            scratch_shapes=[pltpu.VMEM((tile_m, E_pad), jnp.float32)],
        ),
        compiler_params=pltpu.CompilerParams(
            dimension_semantics=("parallel", "arbitrary"),
            vmem_limit_bytes=vmem_limit,
        ),
        cost_estimate=pl.CostEstimate(
            flops=flops, transcendentals=0, bytes_accessed=bytes_accessed),
    )(x2d, w1p, b1p, w2p, b2p)

    return out[:M, :E].reshape(B, S, E)


def _ref_feed_forward(x, w1, b1, w2, b2):
    h = jnp.maximum(jnp.einsum("bse,oe->bso", x, w1) + b1, 0.0)
    return jnp.einsum("bse,oe->bso", h, w2) + b2


if __name__ == "__main__":
    B, S, E = 2, 8, 32  # batch, seq, embed_dim
    key = jax.random.PRNGKey(0)
    kx, kw1, kb1, kw2, kb2 = jax.random.split(key, 5)

    x = jax.random.normal(kx, (B, S, E), dtype=jnp.float32)
    # Deterministic init, PyTorch Linear shapes: weight [out, in], bias [out].
    bound = 1.0 / (E ** 0.5)
    w1 = jax.random.uniform(kw1, (E, E), minval=-bound, maxval=bound, dtype=jnp.float32)
    b1 = jax.random.uniform(kb1, (E,), minval=-bound, maxval=bound, dtype=jnp.float32)
    w2 = jax.random.uniform(kw2, (E, E), minval=-bound, maxval=bound, dtype=jnp.float32)
    b2 = jax.random.uniform(kb2, (E,), minval=-bound, maxval=bound, dtype=jnp.float32)

    out = feed_forward(x, w1, b1, w2, b2)
    jax.block_until_ready(out)

    ref = _ref_feed_forward(x, w1, b1, w2, b2)
    assert out.shape == (B, S, E)
    assert jnp.allclose(out, ref, atol=1e-5, rtol=1e-5)
    print("KERNEL_OK")
</pallas_src>

<mosaic_0001>
module attributes {stable_mosaic.version = 11 : i64} {
  func.func @_ffn_kernel(%arg0: i32, %arg1: i32, %arg2: memref<16x128xf32, #tpu.memory_space<vmem>>, %arg3: memref<128x128xf32, #tpu.memory_space<vmem>>, %arg4: memref<1x128xf32, #tpu.memory_space<vmem>>, %arg5: memref<128x128xf32, #tpu.memory_space<vmem>>, %arg6: memref<1x128xf32, #tpu.memory_space<vmem>>, %arg7: memref<16x128xf32, #tpu.memory_space<vmem>>, %arg8: memref<16x128xf32, #tpu.memory_space<vmem>>) attributes {dimension_semantics = [#tpu.dimension_semantics<parallel>, #tpu.dimension_semantics<arbitrary>], iteration_bounds = array<i64: 1, 1>, scalar_prefetch = 0 : i64, scratch_operands = 1 : i64, tpu.core_type = #tpu.core_type<tc>, window_params = [{transform_indices = @transform_0, window_bounds = array<i64: 16, 128>}, {transform_indices = @transform_1, window_bounds = array<i64: 128, 128>}, {transform_indices = @transform_2, window_bounds = array<i64: 1, 128>}, {transform_indices = @transform_3, window_bounds = array<i64: 128, 128>}, {pipeline_mode = #tpu.pipeline_mode<synchronous>, transform_indices = @transform_4, window_bounds = array<i64: 1, 128>}, {transform_indices = @transform_5, window_bounds = array<i64: 16, 128>}]} {
    %c0_i32 = arith.constant 0 : i32
    %0 = arith.cmpi eq, %arg1, %c0_i32 : i32
    %1 = arith.extui %0 : i1 to i32
    %c0_i32_0 = arith.constant 0 : i32
    %2 = arith.cmpi ne, %1, %c0_i32_0 : i32
    scf.if %2 {
      %c0_16 = arith.constant 0 : index
      %c0_17 = arith.constant 0 : index
      %19 = vector.load %arg6[%c0_16, %c0_17] : memref<1x128xf32, #tpu.memory_space<vmem>>, vector<1x128xf32>
      %20 = vector.shape_cast %19 : vector<1x128xf32> to vector<1x128xf32>
      %21 = vector.broadcast %20 : vector<1x128xf32> to vector<16x128xf32>
      %c0_18 = arith.constant 0 : index
      %c0_19 = arith.constant 0 : index
      %22 = vector.load %arg8[%c0_18, %c0_19] : memref<16x128xf32, #tpu.memory_space<vmem>>, vector<16x128xf32>
      tpu.vector_store %arg8[%c0_18, %c0_19], %21 {strides = array<i32>} : memref<16x128xf32, #tpu.memory_space<vmem>>, vector<16x128xf32>,
    } else {
    }
    %c0 = arith.constant 0 : index
    %c0_1 = arith.constant 0 : index
    %3 = vector.load %arg2[%c0, %c0_1] : memref<16x128xf32, #tpu.memory_space<vmem>>, vector<16x128xf32>
    %c0_2 = arith.constant 0 : index
    %c0_3 = arith.constant 0 : index
    %4 = vector.load %arg3[%c0_2, %c0_3] : memref<128x128xf32, #tpu.memory_space<vmem>>, vector<128x128xf32>
    %cst = arith.constant dense<0.000000e+00> : vector<16x128xf32>
    %5 = tpu.matmul %3, %4, %cst {dimension_numbers = #tpu.dot_dimension_numbers<[1], [1], [0], [0], [0, 0, 1, 0], [], []>} : vector<16x128xf32>, vector<128x128xf32>, vector<16x128xf32> -> vector<16x128xf32>
    %c0_4 = arith.constant 0 : index
    %c0_5 = arith.constant 0 : index
    %6 = vector.load %arg4[%c0_4, %c0_5] : memref<1x128xf32, #tpu.memory_space<vmem>>, vector<1x128xf32>
    %7 = vector.broadcast %6 : vector<1x128xf32> to vector<16x128xf32>
    %8 = arith.addf %5, %7 : vector<16x128xf32>
    %cst_6 = arith.constant 0.000000e+00 : f32
    %9 = vector.broadcast %cst_6 : f32 to vector<16x128xf32>
    %10 = arith.maximumf %8, %9 : vector<16x128xf32>
    %c0_7 = arith.constant 0 : index
    %c0_8 = arith.constant 0 : index
    %11 = vector.load %arg8[%c0_7, %c0_8] : memref<16x128xf32, #tpu.memory_space<vmem>>, vector<16x128xf32>
    %c0_9 = arith.constant 0 : index
    %c0_10 = arith.constant 0 : index
    %12 = vector.load %arg5[%c0_9, %c0_10] : memref<128x128xf32, #tpu.memory_space<vmem>>, vector<128x128xf32>
    %cst_11 = arith.constant dense<0.000000e+00> : vector<16x128xf32>
    %13 = tpu.matmul %10, %12, %cst_11 {dimension_numbers = #tpu.dot_dimension_numbers<[1], [1], [0], [0], [0, 0, 1, 0], [], []>} : vector<16x128xf32>, vector<128x128xf32>, vector<16x128xf32> -> vector<16x128xf32>
    %14 = arith.addf %11, %13 : vector<16x128xf32>
    %c0_12 = arith.constant 0 : index
    %c0_13 = arith.constant 0 : index
    %15 = vector.load %arg8[%c0_12, %c0_13] : memref<16x128xf32, #tpu.memory_space<vmem>>, vector<16x128xf32>
    tpu.vector_store %arg8[%c0_12, %c0_13], %14 {strides = array<i32>} : memref<16x128xf32, #tpu.memory_space<vmem>>, vector<16x128xf32>,
    %c0_i32_14 = arith.constant 0 : i32
    %16 = arith.cmpi eq, %arg1, %c0_i32_14 : i32
    %17 = arith.extui %16 : i1 to i32
    %c0_i32_15 = arith.constant 0 : i32
    %18 = arith.cmpi ne, %17, %c0_i32_15 : i32
    scf.if %18 {
      %c0_16 = arith.constant 0 : index
      %c0_17 = arith.constant 0 : index
      %19 = vector.load %arg8[%c0_16, %c0_17] : memref<16x128xf32, #tpu.memory_space<vmem>>, vector<16x128xf32>
      %c0_18 = arith.constant 0 : index
      %c0_19 = arith.constant 0 : index
      %20 = vector.load %arg7[%c0_18, %c0_19] : memref<16x128xf32, #tpu.memory_space<vmem>>, vector<16x128xf32>
      tpu.vector_store %arg7[%c0_18, %c0_19], %19 {strides = array<i32>} : memref<16x128xf32, #tpu.memory_space<vmem>>, vector<16x128xf32>,
    } else {
    }
    return
  }
  func.func @transform_0(%arg0: i32, %arg1: i32) -> (i32, i32) {
    %c0_i32 = arith.constant 0 : i32
    %c0_i32_0 = arith.constant 0 : i32
    return %arg0, %c0_i32 : i32, i32
  }
  func.func @transform_1(%arg0: i32, %arg1: i32) -> (i32, i32) {
    %c0_i32 = arith.constant 0 : i32
    %c0_i32_0 = arith.constant 0 : i32
    return %arg1, %c0_i32 : i32, i32
  }
  func.func @transform_2(%arg0: i32, %arg1: i32) -> (i32, i32) {
    %c0_i32 = arith.constant 0 : i32
    %c0_i32_0 = arith.constant 0 : i32
    return %c0_i32, %arg1 : i32, i32
  }
  func.func @transform_3(%arg0: i32, %arg1: i32) -> (i32, i32) {
    %c0_i32 = arith.constant 0 : i32
    %c0_i32_0 = arith.constant 0 : i32
    return %c0_i32, %arg1 : i32, i32
  }
  func.func @transform_4(%arg0: i32, %arg1: i32) -> (i32, i32) {
    %c0_i32 = arith.constant 0 : i32
    %c0_i32_0 = arith.constant 0 : i32
    %c0_i32_1 = arith.constant 0 : i32
    return %c0_i32, %c0_i32_0 : i32, i32
  }
  func.func @transform_5(%arg0: i32, %arg1: i32) -> (i32, i32) {
    %c0_i32 = arith.constant 0 : i32
    %c0_i32_0 = arith.constant 0 : i32
    return %arg0, %c0_i32 : i32, i32
  }
}

</mosaic_0001>

<bundles_post_ra>
// kernel: tpu_custom_call.1
= control target key start
LH: loop header
LB: loop body
LE: loop exit
PB: predicated region body
PF: predicated region fallthrough
CT: control target
= control target key end

     0   :  { %10 = vsyncpa [#allocation4], 0  ;;  %s680_s0 = inlined_call_operand.hbm [shape: f32[16,128], index: 0, kind: input, shape index: {}]   ;;  %s681_s1 = inlined_call_operand.hbm [shape: f32[128,128], index: 1, kind: input, shape index: {}]   ;;  %s682_s2 = inlined_call_operand.vmem [shape: f32[1,128], index: 2, kind: input, shape index: {}]   ;;  %s683_s3 = inlined_call_operand.hbm [shape: f32[128,128], index: 3, kind: input, shape index: {}]   ;;  %s684_s4 = inlined_call_operand.vmem [shape: f32[1,128], index: 4, kind: input, shape index: {}]   ;;  %s685_s5 = inlined_call_operand.hbm [shape: f32[16,128], index: 5, kind: output, shape index: {}]  }
   0x1   :  { %11 = vsyncpa [#allocation7], 0 }
   0x2   :  { %12 = vsyncpa [#allocation5], 0  ;;  %s571_s18 = smov [#allocation6]   ;;  %s572_s20 = smov [#allocation3]  }
   0x3   :  { %s30_s19 = sshll.u32 %s571_s18, 4  ;;  %s18_s21 = sshll.u32 %s572_s20, 4  ;;  %s31_s19 = int_to_ptr.vmem [resolvable:$true] %s30_s19  ;;  %s607_s21 = int_to_ptr.vmem [resolvable:$true] %s18_s21 }
   0x4   :  { %s477_s24 = scalar_lea.hbm %s681_s1, 2048 }
   0x5   :  { %p478_p0 = scmp.ne.s32.totalorder %s681_s1, %s477_s24  ;;  %p481_p1 = scmp.lt.u32.totalorder %s477_s24, %s681_s1 }
   0x7   :  { %p483_p2 = pnand %p481_p1, %p478_p0 }
   0x9   :  { %486 = shalt.err (!%p483_p2)
}
   0xa   :  { %s487_s29 = scalar_lea.vmem %s31_s19, 2048  ;;  %p492_p4 = scmp.lt.s32.totalorder %s31_s19, %s31_s19 }
   0xb   :  { %p488_p3 = scmp.ne.s32.totalorder %s31_s19, %s487_s29  ;;  %p493_p5 = scmp.lt.s32.totalorder %s487_s29, %s487_s29 }
   0xd   :  { %p494_p6 = por %p493_p5, %p492_p4 }
   0xf   :  { %p495_p7 = pnand %p494_p6, %p488_p3 }
  0x11   :  { %498 = shalt.err (!%p495_p7)
}
  0x12   :  { %s573_s30 = smov 128   ;;  %s574_s6 = smov 8  }
  0x13   :  { %36 = dma.hbm_to_vmem [thread:$0]  %s681_s1, 2048, %s31_s19, [#allocation7], %s573_s30, %s573_s30, %s574_s6  }
  0x14   :  { %s499_s11 = scalar_lea.hbm %s680_s0, 256 }
  0x15   :  { %p500_p8 = scmp.ne.s32.totalorder %s680_s0, %s499_s11  ;;  %p503_p9 = scmp.lt.u32.totalorder %s499_s11, %s680_s0 }
  0x17   :  { %p505_p10 = pnand %p503_p9, %p500_p8 }
  0x19   :  { %508 = shalt.err (!%p505_p10)
}
  0x1a   :  { %s509_s16 = scalar_lea.vmem %s607_s21, 256  ;;  %p514_p12 = scmp.lt.s32.totalorder %s607_s21, %s607_s21 }
  0x1b   :  { %p510_p11 = scmp.ne.s32.totalorder %s607_s21, %s509_s16  ;;  %p515_p13 = scmp.lt.s32.totalorder %s509_s16, %s509_s16 }
  0x1d   :  { %p516_p0 = por %p515_p13, %p514_p12 }
  0x1f   :  { %p517_p1 = pnand %p516_p0, %p510_p11 }
  0x21   :  { %520 = shalt.err (!%p517_p1)
}
  0x22   :  { %24 = dma.hbm_to_vmem [thread:$0]  %s680_s0, 256, %s607_s21, [#allocation4], %s573_s30, %s573_s30, %s574_s6  }
  0x23   :  { %s575_s18 = smov [#allocation8]   ;;  %s521_s23 = scalar_lea.hbm %s683_s3, 2048 }
  0x24   :  { %s44_s19 = sshll.u32 %s575_s18, 4  ;;  %p522_p2 = scmp.ne.s32.totalorder %s683_s3, %s521_s23  ;;  %s45_s19 = int_to_ptr.vmem [resolvable:$true] %s44_s19 }
  0x25   :  { %p525_p3 = scmp.lt.u32.totalorder %s521_s23, %s683_s3 }
  0x27   :  { %p527_p4 = pnand %p525_p3, %p522_p2 }
  0x29   :  { %530 = shalt.err (!%p527_p4)
}
  0x2a   :  { %s531_s28 = scalar_lea.vmem %s45_s19, 2048  ;;  %p536_p6 = scmp.lt.s32.totalorder %s45_s19, %s45_s19 }
  0x2b   :  { %p532_p5 = scmp.ne.s32.totalorder %s45_s19, %s531_s28  ;;  %p537_p7 = scmp.lt.s32.totalorder %s531_s28, %s531_s28 }
  0x2d   :  { %p538_p8 = por %p537_p7, %p536_p6 }
  0x2f   :  { %p539_p9 = pnand %p538_p8, %p532_p5 }
  0x31   :  { %542 = shalt.err (!%p539_p9)
}
  0x32   :  { %50 = dma.hbm_to_vmem [thread:$0]  %s683_s3, 2048, %s45_s19, [#allocation7], %s573_s30, %s573_s30, %s574_s6  }
  0x33   :  { %565 = dma.done.wait [#allocation4], 256  }
  0x34   :  { %566 = vsyncadd [#allocation4], 4294967040 }
  0x35   :  { %567 = dma.done.wait [#allocation7], 4096  }
  0x36   :  { %568 = vsyncadd [#allocation7], 4294963200  ;;  %v77_v0 = vld [vmem:[#allocation6] sm:$0xff]  ;;  %v78_v1 = vld [vmem:[#allocation6 + $0x8] sm:$0xff]  ;;  %s576_s9 = smov [#allocation9]  }
  0x37   :  { %v79_v2 = vld [vmem:[#allocation6 + $0x10] sm:$0xff]  ;;  %v407_v3 = vpack.c.bf16 %v78_v1, %v77_v0  ;;  %v80_v4 = vld [vmem:[#allocation6 + $0x18] sm:$0xff]  ;;  %v81_v6 = vld [vmem:[#allocation6 + $0x20] sm:$0xff]  ;;  %s286_s10 = sshll.u32 %s576_s9, 4  ;;  %s287_s10 = int_to_ptr.vmem [resolvable:$true] %s286_s10 }
  0x38   :  { %v411_v5 = vpack.c.bf16 %v80_v4, %v79_v2  ;;  %v82_v7 = vld [vmem:[#allocation6 + $0x28] sm:$0xff]  ;;  %v75_v8 = vld [vmem:[#allocation3] sm:$0xff]  ;;  %v179_v9 = vld [vmem:[#allocation8] sm:$0xff]  ;;  %p548_p11 = scmp.lt.s32.totalorder %s287_s10, %s287_s10 }
  0x39   :  { %408 = vmatprep.subr.bf16.mxu0 %v407_v3  ;;  %369 = vmatprep.mubr.f32.mxu0 %v75_v8  ;;  %v180_v10 = vld [vmem:[#allocation8 + $0x8] sm:$0xff]  ;;  %v181_v11 = vld [vmem:[#allocation8 + $0x10] sm:$0xff]  ;;  %v182_v13 = vld [vmem:[#allocation8 + $0x18] sm:$0xff]  ;;  %v415_v15 = vpack.c.bf16 %v82_v7, %v81_v6 }
  0x3a   :  { %410 = vmatpush3.bf16.xpose.msra.mxu0 %v407_v3  ;;  %v439_v12 = vpack.c.bf16 %v180_v10, %v179_v9  ;;  %v443_v14 = vpack.c.bf16 %v182_v13, %v181_v11  ;;  %v183_v16 = vld [vmem:[#allocation8 + $0x20] sm:$0xff]  ;;  %v184_v17 = vld [vmem:[#allocation8 + $0x28] sm:$0xff]  ;;  %v83_v18 = vld [vmem:[#allocation6 + $0x30] sm:$0xff] }
  0x3b   :  { %412 = vmatprep.subr.bf16.mxu0 %v411_v5  ;;  %v84_v19 = vld [vmem:[#allocation6 + $0x38] sm:$0xff]  ;;  %v447_v20 = vpack.c.bf16 %v184_v17, %v183_v16  ;;  %v185_v22 = vld [vmem:[#allocation8 + $0x30] sm:$0xff]  ;;  %v85_v24 = vld [vmem:[#allocation6 + $0x40] sm:$0xff] }
  0x3c   :  { %440 = vmatprep.subr.bf16.mxu1 %v439_v12  ;;  %v419_v21 = vpack.c.bf16 %v84_v19, %v83_v18  ;;  %v186_v23 = vld [vmem:[#allocation8 + $0x38] sm:$0xff]  ;;  %v86_v25 = vld [vmem:[#allocation6 + $0x48] sm:$0xff]  ;;  %v187_v28 = vld [vmem:[#allocation8 + $0x40] sm:$0xff] }
  0x3d   :  { %442 = vmatpush3.bf16.xpose.msra.mxu1 %v439_v12  ;;  %v451_v26 = vpack.c.bf16 %v186_v23, %v185_v22  ;;  %v423_v27 = vpack.c.bf16 %v86_v25, %v85_v24  ;;  %v188_v29 = vld [vmem:[#allocation8 + $0x48] sm:$0xff]  ;;  %v87_v30 = vld [vmem:[#allocation6 + $0x50] sm:$0xff]  ;;  %v88_v31 = vld [vmem:[#allocation6 + $0x58] sm:$0xff] }
  0x3e   :  { %444 = vmatprep.subr.bf16.mxu1 %v443_v14  ;;  %v455_v32 = vpack.c.bf16 %v188_v29, %v187_v28  ;;  %v427_v33 = vpack.c.bf16 %v88_v31, %v87_v30  ;;  %v189_v34 = vld [vmem:[#allocation8 + $0x50] sm:$0xff]  ;;  %v190_v35 = vld [vmem:[#allocation8 + $0x58] sm:$0xff]  ;;  %v89_v36 = vld [vmem:[#allocation6 + $0x60] sm:$0xff] }
  0x3f   :  { %v90_v37 = vld [vmem:[#allocation6 + $0x68] sm:$0xff]  ;;  %v459_v38 = vpack.c.bf16 %v190_v35, %v189_v34  ;;  %v191_v40 = vld [vmem:[#allocation8 + $0x60] sm:$0xff]  ;;  %v91_v42 = vld [vmem:[#allocation6 + $0x70] sm:$0xff] }
  0x40   :  { %v431_v39 = vpack.c.bf16 %v90_v37, %v89_v36  ;;  %v192_v41 = vld [vmem:[#allocation8 + $0x68] sm:$0xff]  ;;  %v92_v43 = vld [vmem:[#allocation6 + $0x78] sm:$0xff]  ;;  %v193_v46 = vld [vmem:[#allocation8 + $0x70] sm:$0xff] }
  0x41   :  { %v463_v44 = vpack.c.bf16 %v192_v41, %v191_v40  ;;  %v435_v45 = vpack.c.bf16 %v92_v43, %v91_v42  ;;  %v194_v47 = vld [vmem:[#allocation8 + $0x78] sm:$0xff]  ;;  %v300_v50 = vld [vmem:[%s682_s2] ss:$0 sm:$0xff]  ;;  %s543_s2 = scalar_lea.vmem %s287_s10, 256 }
  0x42   :  { %414 = vmatpush3.bf16.xpose.msra.mxu0 %v411_v5  ;;  %v467_v48 = vpack.c.bf16 %v194_v47, %v193_v46  ;;  %v76_v49 = vld [vmem:[#allocation3 + $0x8] sm:$0xff]  ;;  %v299_v57 = vld [vmem:[%s684_s4] ss:$0 sm:$0xff]  ;;  %p544_p10 = scmp.ne.s32.totalorder %s287_s10, %s543_s2  ;;  %p549_p12 = scmp.lt.s32.totalorder %s543_s2, %s543_s2 }
  0x43   :  { %416 = vmatprep.subr.bf16.mxu0 %v415_v15 }
  0x44   :  { %p550_p13 = por %p549_p12, %p548_p11 }
  0x45   :  { %446 = vmatpush3.bf16.xpose.msra.mxu1 %v443_v14 }
  0x46   :  { %448 = vmatprep.subr.bf16.mxu1 %v447_v20  ;;  %p551_p0 = pnand %p550_p13, %p544_p10 }
  0x4a   :  { %418 = vmatpush3.bf16.xpose.msra.mxu0 %v415_v15 }
  0x4b   :  { %420 = vmatprep.subr.bf16.mxu0 %v419_v21 }
  0x4d   :  { %450 = vmatpush3.bf16.xpose.msra.mxu1 %v447_v20 }
  0x4e   :  { %452 = vmatprep.subr.bf16.mxu1 %v451_v26 }
  0x52   :  { %422 = vmatpush3.bf16.xpose.msra.mxu0 %v419_v21 }
  0x53   :  { %424 = vmatprep.subr.bf16.mxu0 %v423_v27 }
  0x55   :  { %454 = vmatpush3.bf16.xpose.msra.mxu1 %v451_v26 }
  0x56   :  { %456 = vmatprep.subr.bf16.mxu1 %v455_v32 }
  0x5a   :  { %426 = vmatpush3.bf16.xpose.msra.mxu0 %v423_v27 }
  0x5b   :  { %428 = vmatprep.subr.bf16.mxu0 %v427_v33 }
  0x5d   :  { %458 = vmatpush3.bf16.xpose.msra.mxu1 %v455_v32 }
  0x5e   :  { %460 = vmatprep.subr.bf16.mxu1 %v459_v38 }
  0x62   :  { %430 = vmatpush3.bf16.xpose.msra.mxu0 %v427_v33 }
  0x63   :  { %432 = vmatprep.subr.bf16.mxu0 %v431_v39 }
  0x65   :  { %462 = vmatpush3.bf16.xpose.msra.mxu1 %v459_v38 }
  0x66   :  { %464 = vmatprep.subr.bf16.mxu1 %v463_v44 }
  0x6a   :  { %434 = vmatpush3.bf16.xpose.msra.mxu0 %v431_v39 }
  0x6b   :  { %436 = vmatprep.subr.bf16.mxu0 %v435_v45 }
  0x6d   :  { %466 = vmatpush3.bf16.xpose.msra.mxu1 %v463_v44 }
  0x6e   :  { %468 = vmatprep.subr.bf16.mxu1 %v467_v48 }
  0x72   :  { %438 = vmatpush3.bf16.xpose.msra.mxu0 %v435_v45 }
  0x75   :  { %470 = vmatpush3.bf16.xpose.msra.mxu1 %v467_v48 }
  0x79   :  { %370 = vmatmul.mubr.f32.vlgmr.msra.gmra.mrb[0].mxu0 %v76_v49 }
 0x14c   :  { %v371_v51 = vpop.f32.mrb[0].mxu0 }
 0x14d   :  { %v172_v52 = vadd.f32 %v371_v51, %v300_v50  ;;  %v166_v53 = vpop.f32.mrb[1].mxu0 }
 0x14e   :  { %v167_v54 = vadd.f32 %v300_v50, %v166_v53 }
 0x14f   :  { %v176_v56 = vmax.f32 %v172_v52, 0.0 }
 0x150   :  { %v175_v55 = vmax.f32 %v167_v54, 0.0 }
 0x152   :  { %404 = vmatprep.mubr.f32.mxu1 %v175_v55 }
 0x153   :  { %405 = vmatmul.mubr.f32.vlgmr.msra.gmra.mrb[0].mxu1 %v176_v56 }
 0x226   :  { %v406_v58 = vpop.f32.mrb[0].mxu1 }
 0x227   :  { %v271_v59 = vadd.f32 %v406_v58, %v299_v57  ;;  %v261_v60 = vpop.f32.mrb[1].mxu1 }
 0x228   :  { %v270_v61 = vadd.f32 %v299_v57, %v261_v60 }
 0x229   :  { %280 = vst [vmem:[#allocation9 + $0x8] sm:$0xff] %v271_v59 }
 0x22a   :  { %279 = vst [vmem:[#allocation9] sm:$0xff] %v270_v61 }
 0x22b   :  { %554 = shalt.err (!%p551_p0)
}
 0x22c   :  { %s555_s4 = scalar_lea.hbm %s685_s5, 256 }
 0x22d   :  { %p556_p1 = scmp.ne.s32.totalorder %s685_s5, %s555_s4  ;;  %p559_p2 = scmp.lt.u32.totalorder %s555_s4, %s685_s5 }
 0x22f   :  { %p561_p3 = pnand %p559_p2, %p556_p1 }
 0x231   :  { %564 = shalt.err (!%p561_p3)
}
 0x232   :  { %292 = dma.vmem_to_hbm [thread:$0]  %s287_s10, 256, %s685_s5, [#allocation5], %s573_s30, %s573_s30, %s574_s6  }
 0x233   :  { %569 = dma.done.wait [#allocation5], 256  }
 0x234   :  { %570 = vsyncadd [#allocation5], 4294967040 }
 0x235   :  { %296 = vsyncpa [#allocation4], 1 }
 0x236   :  { %297 = vsyncpa [#allocation7], 1 }
 0x237   :  { %298 = vsyncpa [#allocation5], 1 }

</bundles_post_ra>
